<compile_context>
chip_gen: v6e
topology: v6e:2x2x1
jax: 0.10.0
libtpu: 0.0.40
codegen_flags: <defaults>
</compile_context>

<pallas_src>
import functools

import jax
import jax.numpy as jnp
from jax.experimental import pallas as pl
from jax.experimental.pallas import tpu as pltpu


def _wage_quant_kernel(x_ref, o_ref, *, scale, inv_scale, limit_scaled):
    # Compute in f32 regardless of storage dtype (bit-exact vs qtorch ref).
    x = x_ref[...].astype(jnp.float32)
    # Round half away from zero in the |x| domain, clamp with a single upper
    # bound at limit*scale == scale-1 (integer), rescale by the exact
    # power-of-two inverse, then restore the sign with one select.
    q = jnp.minimum(jnp.floor(jnp.abs(x) * scale + 0.5), limit_scaled)
    y = q * inv_scale
    o_ref[...] = jnp.where(x < 0, -y, y).astype(o_ref.dtype)


def wage_quantize_ref(x, bits_A=8):
    """Pure-JAX reference (also the fused single-pass fallback path)."""
    if bits_A == -1:
        return x
    scale = 2.0 ** (bits_A - 1)
    limit = 1.0 - 2.0 ** (1 - bits_A)
    xf = x.astype(jnp.float32)
    q = jnp.sign(xf) * jnp.floor(jnp.abs(xf) * scale + 0.5) / scale
    return jnp.clip(q, -limit, limit).astype(x.dtype)


_LANE_CANDIDATES = (1024, 512, 256, 128)   # widest first
_DEFAULT_TILE_BYTES = 4 << 20              # per input tile; ~16 MiB pipelined total


def wage_quantize(x, bits_A=8, *, tile_bytes=_DEFAULT_TILE_BYTES,
                  min_pallas_elems=1 << 20):
    """Forward pass of WAGEQuantizer(bits_A, bits_E) on an NCHW tensor."""
    if bits_A == -1:
        return x  # identity forward
    n = x.size
    if n == 0:
        return x

    # Tiny tensors: one fused XLA elementwise pass beats kernel launch
    # overhead.  Pass min_pallas_elems=0 to force the Pallas path.
    if n < min_pallas_elems:
        return wage_quantize_ref(x, bits_A)

    # Adaptive lane width: widest power-of-two lane (multiple of 128) that
    # divides n -> metadata-only reshape, no pad, no slice.
    lane = next((l for l in _LANE_CANDIDATES if n % l == 0), None)
    if lane is None:
        # Element count not a multiple of 128: the fused XLA path is a single
        # HBM read+write pass, cheaper than pad -> kernel -> slice.
        # TODO(synk): could instead run a 1-D masked-final-block Pallas kernel.
        return wage_quantize_ref(x, bits_A)

    orig_shape = x.shape
    x2d = x.reshape(-1, lane)              # metadata-only (row-major)
    rows = x2d.shape[0]

    # dtype-aware row block: fixed tile *bytes*, so bf16 gets 2x the rows of
    # f32 at identical VMEM footprint.  Keep rb a multiple of 8 unless it
    # covers the full row extent (full-dim blocks are always legal).
    itemsize = x.dtype.itemsize
    tile_elems = max(tile_bytes // itemsize, lane)
    rb = max((tile_elems // lane) // 8 * 8, 8)
    rb = min(rb, rows)

    scale = float(2.0 ** (bits_A - 1))
    kernel = functools.partial(
        _wage_quant_kernel,
        scale=scale,
        inv_scale=1.0 / scale,             # exact: scale is a power of two
        limit_scaled=scale - 1.0,          # == limit * scale, exactly
    )

    out2d = pl.pallas_call(
        kernel,
        out_shape=jax.ShapeDtypeStruct((rows, lane), x.dtype),
        grid_spec=pltpu.PrefetchScalarGridSpec(
            num_scalar_prefetch=0,
            grid=(pl.cdiv(rows, rb),),     # partial last block handled by Pallas
            in_specs=[pl.BlockSpec((rb, lane), lambda i: (i, 0))],
            out_specs=pl.BlockSpec((rb, lane), lambda i: (i, 0)),
        ),
        compiler_params=pltpu.CompilerParams(
            dimension_semantics=("parallel",),
            vmem_limit_bytes=48 << 20,     # > v5e 16 MiB default; < v7x 64 MiB phys
        ),
        cost_estimate=pl.CostEstimate(
            flops=9 * n,
            transcendentals=0,
            bytes_accessed=2 * n * itemsize,
        ),
    )(x2d)

    return out2d.reshape(orig_shape)

# TODO(synk): backward-pass error quantization (bits_E) and the shift() hook
# are autograd-only behaviour and are not part of this forward kernel.


if __name__ == "__main__":
    bits_A = 8  # WAGEQuantizer(bits_A=8, bits_E=8)

    # Case 1: NCHW f32 activations (batch=2, ch=4, 16x16) -> 2048 elems,
    # lane=1024, single grid step.
    x1 = jax.random.normal(jax.random.PRNGKey(0), (2, 4, 16, 16),
                           dtype=jnp.float32)
    y1 = jax.block_until_ready(wage_quantize(x1, bits_A=bits_A,
                                             min_pallas_elems=0))
    r1 = wage_quantize_ref(x1, bits_A=bits_A)
    assert y1.shape == x1.shape and y1.dtype == x1.dtype
    assert jnp.allclose(y1, r1, atol=1e-6), "f32 mismatch vs reference"

    # Case 2: bf16, element count divisible by 256 but not 1024 -> exercises
    # the adaptive-lane (no pad / no slice) path and in-kernel f32 compute.
    x2 = jax.random.normal(jax.random.PRNGKey(1), (2, 3, 8, 16),
                           dtype=jnp.bfloat16)
    y2 = jax.block_until_ready(wage_quantize(x2, bits_A=bits_A,
                                             min_pallas_elems=0))
    r2 = wage_quantize_ref(x2, bits_A=bits_A)
    assert y2.shape == x2.shape and y2.dtype == x2.dtype
    assert jnp.allclose(y2.astype(jnp.float32), r2.astype(jnp.float32),
                        atol=1e-6), "bf16 mismatch vs reference"

    # Case 3: multi-step grid with a partial final row-block (tile_bytes is
    # shrunk so the small demo tensor spans 2 grid steps: 12 rows, rb=8).
    x3 = jax.random.normal(jax.random.PRNGKey(2), (2, 8, 24, 32),
                           dtype=jnp.float32)
    y3 = jax.block_until_ready(wage_quantize(x3, bits_A=bits_A,
                                             tile_bytes=32 * 1024,
                                             min_pallas_elems=0))
    r3 = wage_quantize_ref(x3, bits_A=bits_A)
    assert jnp.allclose(y3, r3, atol=1e-6), "multi-block mismatch vs reference"

    # Case 4: element count not a multiple of 128 -> routed to the fused
    # single-pass XLA path (no pad/slice double-pass), still correct.
    x4 = jax.random.normal(jax.random.PRNGKey(3), (3, 5, 7, 11),
                           dtype=jnp.bfloat16)
    y4 = jax.block_until_ready(wage_quantize(x4, bits_A=bits_A,
                                             min_pallas_elems=0))
    r4 = wage_quantize_ref(x4, bits_A=bits_A)
    assert jnp.allclose(y4.astype(jnp.float32), r4.astype(jnp.float32),
                        atol=1e-6), "ragged-fallback mismatch vs reference"

    print("KERNEL_OK")
</pallas_src>

<mosaic_0001>
module attributes {stable_mosaic.version = 11 : i64} {
  func.func @_wage_quant_kernel(%arg0: i32, %arg1: memref<2x1024xf32, #tpu.memory_space<vmem>>, %arg2: memref<2x1024xf32, #tpu.memory_space<vmem>>) attributes {dimension_semantics = [#tpu.dimension_semantics<parallel>], iteration_bounds = array<i64: 1>, scalar_prefetch = 0 : i64, scratch_operands = 0 : i64, tpu.core_type = #tpu.core_type<tc>, window_params = [{transform_indices = @transform_0, window_bounds = array<i64: 2, 1024>}, {transform_indices = @transform_1, window_bounds = array<i64: 2, 1024>}]} {
    %c0 = arith.constant 0 : index
    %c0_0 = arith.constant 0 : index
    %0 = vector.load %arg1[%c0, %c0_0] : memref<2x1024xf32, #tpu.memory_space<vmem>>, vector<2x1024xf32>
    %1 = math.absf %0 : vector<2x1024xf32>
    %cst = arith.constant 1.280000e+02 : f32
    %2 = vector.broadcast %cst : f32 to vector<2x1024xf32>
    %3 = arith.mulf %1, %2 : vector<2x1024xf32>
    %cst_1 = arith.constant 5.000000e-01 : f32
    %4 = vector.broadcast %cst_1 : f32 to vector<2x1024xf32>
    %5 = arith.addf %3, %4 : vector<2x1024xf32>
    %6 = math.floor %5 : vector<2x1024xf32>
    %cst_2 = arith.constant 1.270000e+02 : f32
    %7 = vector.broadcast %cst_2 : f32 to vector<2x1024xf32>
    %8 = arith.minimumf %6, %7 : vector<2x1024xf32>
    %cst_3 = arith.constant 7.812500e-03 : f32
    %9 = vector.broadcast %cst_3 : f32 to vector<2x1024xf32>
    %10 = arith.mulf %8, %9 : vector<2x1024xf32>
    %cst_4 = arith.constant 0.000000e+00 : f32
    %11 = vector.broadcast %cst_4 : f32 to vector<2x1024xf32>
    %12 = arith.cmpf olt, %0, %11 : vector<2x1024xf32>
    %cst_5 = arith.constant 0.000000e+00 : f32
    %13 = vector.broadcast %cst_5 : f32 to vector<2x1024xf32>
    %14 = arith.subf %13, %10 : vector<2x1024xf32>
    %15 = arith.select %12, %14, %10 : vector<2x1024xi1>, vector<2x1024xf32>
    %c0_6 = arith.constant 0 : index
    %c0_7 = arith.constant 0 : index
    %16 = vector.load %arg2[%c0_6, %c0_7] : memref<2x1024xf32, #tpu.memory_space<vmem>>, vector<2x1024xf32>
    tpu.vector_store %arg2[%c0_6, %c0_7], %15 {strides = array<i32>} : memref<2x1024xf32, #tpu.memory_space<vmem>>, vector<2x1024xf32>,
    return
  }
  func.func @transform_0(%arg0: i32) -> (i32, i32) {
    %c0_i32 = arith.constant 0 : i32
    %c0_i32_0 = arith.constant 0 : i32
    return %arg0, %c0_i32 : i32, i32
  }
  func.func @transform_1(%arg0: i32) -> (i32, i32) {
    %c0_i32 = arith.constant 0 : i32
    %c0_i32_0 = arith.constant 0 : i32
    return %arg0, %c0_i32 : i32, i32
  }
}

</mosaic_0001>

<bundles_post_ra>
// kernel: tpu_custom_call.1
= control target key start
LH: loop header
LB: loop body
LE: loop exit
PB: predicated region body
PF: predicated region fallthrough
CT: control target
= control target key end

     0   :  { %6 = vsyncpa [#allocation3], 0  ;;  %s122_s0 = inlined_call_operand.hbm [shape: f32[2,1024], index: 0, kind: input, shape index: {}]   ;;  %s123_s1 = inlined_call_operand.hbm [shape: f32[2,1024], index: 1, kind: output, shape index: {}]  }
   0x1   :  { %7 = vsyncpa [#allocation4], 0  ;;  %s104_s6 = smov [#allocation2]  }
   0x2   :  { %s14_s7 = sshll.u32 %s104_s6, 4  ;;  %s15_s7 = int_to_ptr.vmem [resolvable:$true] %s14_s7 }
   0x3   :  { %s68_s8 = scalar_lea.vmem %s15_s7, 256  ;;  %p73_p1 = scmp.lt.s32.totalorder %s15_s7, %s15_s7 }
   0x4   :  { %p69_p0 = scmp.ne.s32.totalorder %s15_s7, %s68_s8  ;;  %p74_p2 = scmp.lt.s32.totalorder %s68_s8, %s68_s8 }
   0x6   :  { %p75_p3 = por %p74_p2, %p73_p1 }
   0x8   :  { %p76_p4 = pnand %p75_p3, %p69_p0 }
   0xa   :  { %79 = shalt.err (!%p76_p4)
}
   0xb   :  { %17 = dma.hbm_to_vmem [thread:$0]  %s122_s0, 256, %s15_s7, [#allocation3]  }
   0xc   :  { %100 = dma.done.wait [#allocation3], 256  }
   0xd   :  { %101 = vsyncadd [#allocation3], 4294967040  ;;  %v21_v0 = vld [vmem:[#allocation2] sm:$0xff]  ;;  %v22_v1 = vld [vmem:[#allocation2 + $0x8] sm:$0xff]  ;;  %s105_s11 = smov [#allocation5]  }
   0xe   :  { %v23_v2 = vand.u32 2147483647, %v21_v0  ;;  %v24_v3 = vand.u32 2147483647, %v22_v1  ;;  %s49_s12 = sshll.u32 %s105_s11, 4  ;;  %vm35_vm0 = vcmp.lt.f32.partialorder %v21_v0, 0.0  ;;  %s50_s12 = int_to_ptr.vmem [resolvable:$true] %s49_s12 }
   0xf   :  { %vm36_vm1 = vcmp.lt.f32.partialorder %v22_v1, 0.0  ;;  %s80_s0 = scalar_lea.vmem %s50_s12, 256  ;;  %p85_p6 = scmp.lt.s32.totalorder %s50_s12, %s50_s12 }
  0x10   :  { %v25_v4 = vmul.f32 128.0, %v23_v2  ;;  %v26_v5 = vmul.f32 128.0, %v24_v3  ;;  %p81_p5 = scmp.ne.s32.totalorder %s50_s12, %s80_s0  ;;  %p86_p7 = scmp.lt.s32.totalorder %s80_s0, %s80_s0 }
  0x12   :  { %v27_v6 = vadd.f32 0.5, %v25_v4  ;;  %v28_v7 = vadd.f32 0.5, %v26_v5  ;;  %p87_p8 = por %p86_p7, %p85_p6 }
  0x14   :  { %v29_v8 = vfloor.f32 %v27_v6  ;;  %v30_v9 = vfloor.f32 %v28_v7  ;;  %p88_p9 = pnand %p87_p8, %p81_p5 }
  0x16   :  { %v31_v10 = vmin.f32 %v29_v8, 127.0  ;;  %v32_v11 = vmin.f32 %v30_v9, 127.0 }
  0x18   :  { %v33_v12 = vmul.f32 0.0078125, %v31_v10  ;;  %v34_v13 = vmul.f32 0.0078125, %v32_v11 }
  0x1a   :  { %v37_v14 = vsub.f32 0.0, %v33_v12  ;;  %v38_v15 = vsub.f32 0.0, %v34_v13 }
  0x1c   :  { %v39_v16 = vsel %vm35_vm0, %v37_v14, %v33_v12  ;;  %v40_v17 = vsel %vm36_vm1, %v38_v15, %v34_v13 }
  0x1d   :  { %41 = vst [vmem:[#allocation5] sm:$0xff] %v39_v16  ;;  %42 = vst [vmem:[#allocation5 + $0x8] sm:$0xff] %v40_v17 }
  0x1e   :  { %91 = shalt.err (!%p88_p9)
}
  0x1f   :  { %52 = dma.vmem_to_hbm [thread:$0]  %s50_s12, 256, %s123_s1, [#allocation4]  }
  0x20   :  { %102 = dma.done.wait [#allocation4], 256  }
  0x21   :  { %103 = vsyncadd [#allocation4], 4294967040 }
  0x22   :  { %56 = vsyncpa [#allocation3], 1 }
  0x23   :  { %57 = vsyncpa [#allocation4], 1 }

</bundles_post_ra>
